<compile_context>
chip_gen: v6e
topology: v6e:2x2x1
jax: 0.10.0
libtpu: 0.0.40
codegen_flags: <defaults>
</compile_context>

<pallas_src>
import functools

import jax
import jax.numpy as jnp
from jax import lax
from jax.experimental import pallas as pl
from jax.experimental.pallas import tpu as pltpu

# Config (cfg.tau / cfg.hard in the reference code).
TAU = 1.0
HARD = True


def _round_up(x, m):
    return (x + m - 1) // m * m


def _on_tpu():
    return jax.default_backend() == "tpu"


def _bf16_eup_ok():
    # v6e / v7x have bf16-capable VPU/EUP; v5e does not (bf16 elementwise is emulated there).
    if not _on_tpu():
        return False
    try:
        kind = jax.devices()[0].device_kind.lower()
    except Exception:
        return False
    return ("v6" in kind) or ("v7" in kind)


def _pick_tile_and_vmem(C, N, E, HW, x_bytes, q_bytes, noise_streamed):
    """Generation- and size-aware token tile + VMEM budget."""
    phys = 128 * 1024 * 1024                       # v5e / v6e physical VMEM
    if _on_tpu():
        try:
            info = pltpu.get_tpu_info()
            phys = int(getattr(info, "vmem_capacity_bytes", phys))
        except Exception:
            pass
    # ~48 MiB on v7x (64 MiB physical), ~96 MiB on v5e/v6e (128 MiB physical)
    budget = min((phys * 3) // 4, 96 * 1024 * 1024)

    per_lane = (2 * C * x_bytes                    # double-buffered x block
                + 2 * E * q_bytes                  # double-buffered q block
                + 2 * 2                            # mask column (bf16)
                + 6 * N * 4)                       # f32/int32 (N, tile) intermediate planes
    if noise_streamed:
        per_lane += 2 * N * 2                      # double-buffered bf16 noise block

    tile = (budget * 2 // 3) // max(per_lane, 1)   # ~1/3 headroom for compiler scratch / copies
    tile = max(128, (tile // 128) * 128)
    tile = min(tile, 8192, _round_up(HW, 128))
    return int(tile), int(budget)


def _vq_kernel(seed_ref, x_ref, w_ref, b_ref, embt_ref, mask_ref, *rest,
               tau, hard, onchip_noise, noise_bf16, strict_ties):
    """One (batch, token-tile) step of the VQ forward.

    seed_ref  : (1,)         int32 SMEM scalar prefetch (unused when noise is streamed)
    x_ref     : (1, C, TM)   activations (native dtype), tokens on lanes
    w_ref     : (N, C) bf16  1x1-conv weight
    b_ref     : (N, 1) f32   1x1-conv bias
    embt_ref  : (E, N) bf16  codebook, transposed
    mask_ref  : (TM, 1) bf16 1.0 for valid tokens, 0.0 for spatial padding
    [noise_ref: (1, N, TM) bf16 pre-generated Gumbel noise -- non-TPU fallback only]
    q_ref     : (1, E, TM)   quantized output, tokens on lanes
    refs_ref  : (1, 1, N, 1) f32 per-tile codebook usage counts
    """
    if onchip_noise:
        q_ref, refs_ref = rest
    else:
        noise_ref, q_ref, refs_ref = rest

    n = w_ref.shape[0]

    # logits^T = W @ x^T + b  (1x1 conv as a native bf16 x bf16 -> f32 MXU matmul)
    xb = x_ref[0].astype(jnp.bfloat16)                                        # (C, TM)
    logits = jnp.dot(w_ref[...], xb, preferred_element_type=jnp.float32) + b_ref[...]

    # Gumbel(0, 1) noise.
    if onchip_noise:
        # Hardware PRNG; fold the (batch, tile) grid position into the seed for stream separation.
        pltpu.prng_seed(seed_ref[0], pl.program_id(0), pl.program_id(1))
        raw = pltpu.prng_random_bits(logits.shape)
        if raw.dtype != jnp.int32:
            raw = pltpu.bitcast(raw, jnp.int32)
        if noise_bf16:
            # v6e/v7x: do the two logs on the bf16 EUP path (~2x transcendental throughput).
            # Use an 8-bit-mantissa uniform so every value is exactly representable in bf16
            # and never rounds to 1.0 (which would produce inf Gumbel samples).
            mant = jnp.bitwise_and(raw, jnp.int32(255))
            u = ((mant.astype(jnp.float32) + 0.5) * (1.0 / 256.0)).astype(jnp.bfloat16)
        else:
            mant = jnp.bitwise_and(raw, jnp.int32((1 << 23) - 1))
            u = (mant.astype(jnp.float32) + 0.5) * (1.0 / float(1 << 23))     # uniform (0, 1)
        g = (-jnp.log(-jnp.log(u))).astype(jnp.float32)
    else:
        g = noise_ref[0].astype(jnp.float32)                                  # (N, TM)

    y = logits + g

    if hard:
        # Forward value of hard gumbel-softmax is the argmax one-hot; argmax is invariant to
        # the positive 1/tau scaling and to softmax, so both are skipped.
        y_max = jnp.max(y, axis=0, keepdims=True)
        if strict_ties:
            row = lax.broadcasted_iota(jnp.int32, y.shape, 0)
            first = jnp.min(jnp.where(y == y_max, row, n), axis=0, keepdims=True)
            onehot = (row == first).astype(jnp.float32)
        else:
            # Ties are measure-zero under continuous Gumbel noise (distinct f32 logits break
            # any residual noise-discretization ties).
            onehot = (y == y_max).astype(jnp.float32)
    else:
        onehot = jax.nn.softmax(y * (1.0 / tau), axis=0)

    onehot_b = onehot.astype(jnp.bfloat16)   # exact for 0/1 on the hard path

    # quantized^T = emb^T @ onehot^T -> (E, TM), lane-dense store
    q = jnp.dot(embt_ref[...], onehot_b, preferred_element_type=jnp.float32)
    q_ref[...] = q[None].astype(q_ref.dtype)

    # dict_refs partial counts on the MXU: onehot @ mask both masks padded tokens and
    # performs the lane reduction (no VPU iota/where, no XLU cross-lane sum).
    refs = jnp.dot(onehot_b, mask_ref[...], preferred_element_type=jnp.float32)   # (N, 1)
    refs_ref[...] = refs[None, None]


def vector_quantizer_forward(x_nchw, conv_w, conv_b, embedding, seed,
                             *, tau=TAU, hard=HARD, out_dtype=jnp.float32,
                             strict_ties=False):
    """x_nchw: (B, num_hiddens, H, W); conv_w: (num_embeddings, num_hiddens);
    conv_b: (num_embeddings,); embedding: (num_embeddings, embedding_dim); seed: int."""
    B, C, H, W = x_nchw.shape
    N, E = embedding.shape
    HW = H * W

    onchip_noise = _on_tpu()                 # hardware PRNG only lowers on real TPU
    noise_bf16 = onchip_noise and _bf16_eup_ok()

    x_bytes = jnp.dtype(x_nchw.dtype).itemsize
    q_bytes = jnp.dtype(out_dtype).itemsize
    tile, vmem_budget = _pick_tile_and_vmem(C, N, E, HW, x_bytes, q_bytes,
                                            noise_streamed=not onchip_noise)
    HW_pad = _round_up(HW, tile)
    s_tiles = HW_pad // tile

    # NCHW -> (B, C, HW) is a free reshape: channel-major with tokens on the lane axis already.
    x_r = x_nchw.reshape(B, C, HW)
    if HW_pad != HW:
        x_r = jnp.pad(x_r, ((0, 0), (0, 0), (0, HW_pad - HW)))

    # Tiny parameters: pre-cast once in the wrapper.
    w = conv_w.astype(jnp.bfloat16)                    # (N, C)
    b_col = conv_b.reshape(N, 1).astype(jnp.float32)   # (N, 1)
    emb_t = embedding.T.astype(jnp.bfloat16)           # (E, N)
    # TODO(synk): bf16 conv-weight/codebook rounds logits/q by ~2^-8 rel. vs the f32 reference.

    # Valid-token mask column (1.0 / 0.0), bf16 -- exact, shared by every batch row.
    mask = (jnp.arange(HW_pad, dtype=jnp.int32) < HW).astype(jnp.bfloat16).reshape(HW_pad, 1)

    seed_arr = jnp.asarray([seed], dtype=jnp.int32)

    kernel = functools.partial(_vq_kernel, tau=float(tau), hard=hard,
                               onchip_noise=onchip_noise, noise_bf16=noise_bf16,
                               strict_ties=strict_ties)

    in_specs = [
        pl.BlockSpec((1, C, tile), lambda b, s, seed: (b, 0, s)),   # x token tile
        pl.BlockSpec((N, C), lambda b, s, seed: (0, 0)),            # conv weight
        pl.BlockSpec((N, 1), lambda b, s, seed: (0, 0)),            # conv bias
        pl.BlockSpec((E, N), lambda b, s, seed: (0, 0)),            # codebook^T
        pl.BlockSpec((tile, 1), lambda b, s, seed: (s, 0)),         # valid-token mask
    ]
    operands = [x_r, w, b_col, emb_t, mask]

    if not onchip_noise:
        # Non-TPU / interpreter fallback: the stateful TPU PRNG has no lowering there,
        # so pre-generate the Gumbel noise and stream it per tile (bf16).
        g = jax.random.gumbel(jax.random.PRNGKey(int(seed)), (B, N, HW_pad),
                              dtype=jnp.float32).astype(jnp.bfloat16)
        in_specs.append(pl.BlockSpec((1, N, tile), lambda b, s, seed: (b, 0, s)))
        operands.append(g)

    q_p, refs = pl.pallas_call(
        kernel,
        out_shape=(
            jax.ShapeDtypeStruct((B, E, HW_pad), out_dtype),
            jax.ShapeDtypeStruct((B, s_tiles, N, 1), jnp.float32),
        ),
        grid_spec=pltpu.PrefetchScalarGridSpec(
            num_scalar_prefetch=1,
            grid=(B, s_tiles),
            in_specs=in_specs,
            out_specs=[
                pl.BlockSpec((1, E, tile), lambda b, s, seed: (b, 0, s)),    # quantized tile
                pl.BlockSpec((1, 1, N, 1), lambda b, s, seed: (b, s, 0, 0)),  # per-tile refs
            ],
        ),
        compiler_params=pltpu.CompilerParams(
            dimension_semantics=("parallel", "parallel"),   # no grid-resident state
            vmem_limit_bytes=vmem_budget,
        ),
    )(seed_arr, *operands)

    # (B, E, HW) -> (B, E, H, W): free reshape, no transpose.
    quantized = q_p[:, :, :HW].reshape(B, E, H, W)

    dict_refs = jnp.sum(refs, axis=(0, 1)).reshape(N)

    # perplexity = exp(sum(entr(normalize(dict_refs, p=1)))) -- tiny scalar epilogue in JAX
    denom = jnp.maximum(jnp.sum(jnp.abs(dict_refs)), 1e-12)
    p = dict_refs / denom
    entr = jnp.where(p > 0, -p * jnp.log(p), 0.0)
    perplexity = jnp.exp(jnp.sum(entr))

    return quantized, dict_refs, perplexity


if __name__ == "__main__":
    # Small shapes consistent with the module's forward.
    B, num_hiddens, Hs, Ws = 2, 4, 16, 16
    num_embeddings, embedding_dim = 16, 8

    key = jax.random.PRNGKey(0)
    k_x, k_w, k_b, k_emb = jax.random.split(key, 4)

    x = jax.random.normal(k_x, (B, num_hiddens, Hs, Ws), dtype=jnp.float32)

    # Deterministic parameter init (shapes from __init__):
    #   embedding.weight ~ Normal(0, 0.2)
    embedding = 0.2 * jax.random.normal(k_emb, (num_embeddings, embedding_dim),
                                        dtype=jnp.float32)
    #   Conv2d(num_hiddens, num_embeddings, 1): weight (N, C), bias (N,)
    bound = 1.0 / (num_hiddens ** 0.5)
    conv_w = jax.random.uniform(k_w, (num_embeddings, num_hiddens),
                                minval=-bound, maxval=bound, dtype=jnp.float32)
    conv_b = jax.random.uniform(k_b, (num_embeddings,),
                                minval=-bound, maxval=bound, dtype=jnp.float32)

    quantized, dict_refs, perplexity = vector_quantizer_forward(
        x, conv_w, conv_b, embedding, seed=0, tau=TAU, hard=HARD)
    jax.block_until_ready((quantized, dict_refs, perplexity))

    assert quantized.shape == (B, embedding_dim, Hs, Ws)
    assert dict_refs.shape == (num_embeddings,)
    assert perplexity.shape == ()
    assert bool(jnp.all(jnp.isfinite(quantized)))
    # with hard=True every token contributes exactly one count
    assert abs(float(jnp.sum(dict_refs)) - B * Hs * Ws) < 1e-3
    print("KERNEL_OK")
</pallas_src>

<mosaic_0001>
module attributes {stable_mosaic.version = 11 : i64} {
  func.func @_vq_kernel(%arg0: i32, %arg1: i32, %arg2: memref<1xi32, #tpu.memory_space<smem>>, %arg3: memref<1x4x256xf32, #tpu.memory_space<vmem>>, %arg4: memref<16x4xbf16, #tpu.memory_space<vmem>>, %arg5: memref<16x1xf32, #tpu.memory_space<vmem>>, %arg6: memref<8x16xbf16, #tpu.memory_space<vmem>>, %arg7: memref<256x1xbf16, #tpu.memory_space<vmem>>, %arg8: memref<1x16x256xbf16, #tpu.memory_space<vmem>>, %arg9: memref<1x8x256xf32, #tpu.memory_space<vmem>>, %arg10: memref<1x1x16x1xf32, #tpu.memory_space<vmem>>) attributes {dimension_semantics = [#tpu.dimension_semantics<parallel>, #tpu.dimension_semantics<parallel>], iteration_bounds = array<i64: 2, 1>, scalar_prefetch = 1 : i64, scratch_operands = 0 : i64, tpu.core_type = #tpu.core_type<tc>, window_params = [{transform_indices = @transform_0, window_bounds = array<i64: 1, 4, 256>}, {pipeline_mode = #tpu.pipeline_mode<synchronous>, transform_indices = @transform_1, window_bounds = array<i64: 16, 4>}, {pipeline_mode = #tpu.pipeline_mode<synchronous>, transform_indices = @transform_2, window_bounds = array<i64: 16, 1>}, {pipeline_mode = #tpu.pipeline_mode<synchronous>, transform_indices = @transform_3, window_bounds = array<i64: 8, 16>}, {transform_indices = @transform_4, window_bounds = array<i64: 256, 1>}, {transform_indices = @transform_5, window_bounds = array<i64: 1, 16, 256>}, {transform_indices = @transform_6, window_bounds = array<i64: 1, 8, 256>}, {transform_indices = @transform_7, window_bounds = array<i64: 1, 1, 16, 1>}]} {
    %c0 = arith.constant 0 : index
    %c0_0 = arith.constant 0 : index
    %c0_1 = arith.constant 0 : index
    %0 = vector.load %arg3[%c0, %c0_0, %c0_1] : memref<1x4x256xf32, #tpu.memory_space<vmem>>, vector<1x4x256xf32>
    %1 = vector.shape_cast %0 : vector<1x4x256xf32> to vector<4x256xf32>
    %2 = arith.truncf %1 : vector<4x256xf32> to vector<4x256xbf16>
    %c0_2 = arith.constant 0 : index
    %c0_3 = arith.constant 0 : index
    %3 = vector.load %arg4[%c0_2, %c0_3] : memref<16x4xbf16, #tpu.memory_space<vmem>>, vector<16x4xbf16>
    %cst = arith.constant dense<0.000000e+00> : vector<16x256xf32>
    %4 = tpu.matmul %3, %2, %cst {dimension_numbers = #tpu.dot_dimension_numbers<[1], [0], [0], [1], [0, 0, 1, 1], [], []>} : vector<16x4xbf16>, vector<4x256xbf16>, vector<16x256xf32> -> vector<16x256xf32>
    %c0_4 = arith.constant 0 : index
    %c0_5 = arith.constant 0 : index
    %5 = vector.load %arg5[%c0_4, %c0_5] : memref<16x1xf32, #tpu.memory_space<vmem>>, vector<16x1xf32>
    %6 = vector.broadcast %5 : vector<16x1xf32> to vector<16x256xf32>
    %7 = arith.addf %4, %6 : vector<16x256xf32>
    %c0_6 = arith.constant 0 : index
    %c0_7 = arith.constant 0 : index
    %c0_8 = arith.constant 0 : index
    %8 = vector.load %arg8[%c0_6, %c0_7, %c0_8] : memref<1x16x256xbf16, #tpu.memory_space<vmem>>, vector<1x16x256xbf16>
    %9 = vector.shape_cast %8 : vector<1x16x256xbf16> to vector<16x256xbf16>
    %10 = arith.extf %9 : vector<16x256xbf16> to vector<16x256xf32>
    %11 = arith.addf %7, %10 : vector<16x256xf32>
    %cst_9 = arith.constant dense<0xFF800000> : vector<256xf32>
    %12 = vector.multi_reduction <maximumf>, %11, %cst_9 [0] : vector<16x256xf32> to vector<256xf32>
    %13 = vector.shape_cast %12 : vector<256xf32> to vector<1x256xf32>
    %14 = vector.broadcast %13 : vector<1x256xf32> to vector<16x256xf32>
    %15 = arith.cmpf oeq, %11, %14 : vector<16x256xf32>
    %16 = arith.extui %15 : vector<16x256xi1> to vector<16x256xi32>
    %17 = arith.sitofp %16 : vector<16x256xi32> to vector<16x256xf32>
    %18 = arith.truncf %17 : vector<16x256xf32> to vector<16x256xbf16>
    %c0_10 = arith.constant 0 : index
    %c0_11 = arith.constant 0 : index
    %19 = vector.load %arg6[%c0_10, %c0_11] : memref<8x16xbf16, #tpu.memory_space<vmem>>, vector<8x16xbf16>
    %cst_12 = arith.constant dense<0.000000e+00> : vector<8x256xf32>
    %20 = tpu.matmul %19, %18, %cst_12 {dimension_numbers = #tpu.dot_dimension_numbers<[1], [0], [0], [1], [0, 0, 1, 1], [], []>} : vector<8x16xbf16>, vector<16x256xbf16>, vector<8x256xf32> -> vector<8x256xf32>
    %21 = vector.shape_cast %20 : vector<8x256xf32> to vector<1x8x256xf32>
    %c0_13 = arith.constant 0 : index
    %c0_14 = arith.constant 0 : index
    %c0_15 = arith.constant 0 : index
    %22 = vector.load %arg9[%c0_13, %c0_14, %c0_15] : memref<1x8x256xf32, #tpu.memory_space<vmem>>, vector<1x8x256xf32>
    tpu.vector_store %arg9[%c0_13, %c0_14, %c0_15], %21 {strides = array<i32>} : memref<1x8x256xf32, #tpu.memory_space<vmem>>, vector<1x8x256xf32>,
    %c0_16 = arith.constant 0 : index
    %c0_17 = arith.constant 0 : index
    %23 = vector.load %arg7[%c0_16, %c0_17] : memref<256x1xbf16, #tpu.memory_space<vmem>>, vector<256x1xbf16>
    %cst_18 = arith.constant dense<0.000000e+00> : vector<16x1xf32>
    %24 = tpu.matmul %18, %23, %cst_18 {dimension_numbers = #tpu.dot_dimension_numbers<[1], [0], [0], [1], [0, 0, 1, 1], [], []>} : vector<16x256xbf16>, vector<256x1xbf16>, vector<16x1xf32> -> vector<16x1xf32>
    %25 = vector.shape_cast %24 : vector<16x1xf32> to vector<1x1x16x1xf32>
    %c0_19 = arith.constant 0 : index
    %c0_20 = arith.constant 0 : index
    %c0_21 = arith.constant 0 : index
    %c0_22 = arith.constant 0 : index
    %26 = vector.load %arg10[%c0_19, %c0_20, %c0_21, %c0_22] : memref<1x1x16x1xf32, #tpu.memory_space<vmem>>, vector<1x1x16x1xf32>
    tpu.vector_store %arg10[%c0_19, %c0_20, %c0_21, %c0_22], %25 {strides = array<i32>} : memref<1x1x16x1xf32, #tpu.memory_space<vmem>>, vector<1x1x16x1xf32>,
    return
  }
  func.func @transform_0(%arg0: i32, %arg1: i32, %arg2: memref<1xi32, #tpu.memory_space<smem>>) -> (i32, i32, i32) {
    %c0_i32 = arith.constant 0 : i32
    %c0_i32_0 = arith.constant 0 : i32
    return %arg0, %c0_i32, %arg1 : i32, i32, i32
  }
  func.func @transform_1(%arg0: i32, %arg1: i32, %arg2: memref<1xi32, #tpu.memory_space<smem>>) -> (i32, i32) {
    %c0_i32 = arith.constant 0 : i32
    %c0_i32_0 = arith.constant 0 : i32
    %c0_i32_1 = arith.constant 0 : i32
    return %c0_i32, %c0_i32_0 : i32, i32
  }
  func.func @transform_2(%arg0: i32, %arg1: i32, %arg2: memref<1xi32, #tpu.memory_space<smem>>) -> (i32, i32) {
    %c0_i32 = arith.constant 0 : i32
    %c0_i32_0 = arith.constant 0 : i32
    %c0_i32_1 = arith.constant 0 : i32
    return %c0_i32, %c0_i32_0 : i32, i32
  }
  func.func @transform_3(%arg0: i32, %arg1: i32, %arg2: memref<1xi32, #tpu.memory_space<smem>>) -> (i32, i32) {
    %c0_i32 = arith.constant 0 : i32
    %c0_i32_0 = arith.constant 0 : i32
    %c0_i32_1 = arith.constant 0 : i32
    return %c0_i32, %c0_i32_0 : i32, i32
  }
  func.func @transform_4(%arg0: i32, %arg1: i32, %arg2: memref<1xi32, #tpu.memory_space<smem>>) -> (i32, i32) {
    %c0_i32 = arith.constant 0 : i32
    %c0_i32_0 = arith.constant 0 : i32
    return %arg1, %c0_i32 : i32, i32
  }
  func.func @transform_5(%arg0: i32, %arg1: i32, %arg2: memref<1xi32, #tpu.memory_space<smem>>) -> (i32, i32, i32) {
    %c0_i32 = arith.constant 0 : i32
    %c0_i32_0 = arith.constant 0 : i32
    return %arg0, %c0_i32, %arg1 : i32, i32, i32
  }
  func.func @transform_6(%arg0: i32, %arg1: i32, %arg2: memref<1xi32, #tpu.memory_space<smem>>) -> (i32, i32, i32) {
    %c0_i32 = arith.constant 0 : i32
    %c0_i32_0 = arith.constant 0 : i32
    return %arg0, %c0_i32, %arg1 : i32, i32, i32
  }
  func.func @transform_7(%arg0: i32, %arg1: i32, %arg2: memref<1xi32, #tpu.memory_space<smem>>) -> (i32, i32, i32, i32) {
    %c0_i32 = arith.constant 0 : i32
    %c0_i32_0 = arith.constant 0 : i32
    %c0_i32_1 = arith.constant 0 : i32
    return %arg0, %arg1, %c0_i32, %c0_i32_0 : i32, i32, i32, i32
  }
}

</mosaic_0001>

<bundles_post_ra>
// kernel: tpu_custom_call.1
= control target key start
LH: loop header
LB: loop body
LE: loop exit
PB: predicated region body
PF: predicated region fallthrough
CT: control target
= control target key end

     0   :  { %15 = vsyncpa [#allocation5], 0  ;;  %s1377_s0 = inlined_call_operand.<no memory space> [shape: s32[1], index: 0, kind: input, shape index: {}]   ;;  %s1378_s1 = inlined_call_operand.vmem [shape: f32[2,4,256], index: 1, kind: input, shape index: {}]   ;;  %s1379_s2 = inlined_call_operand.vmem [shape: bf16[16,4], index: 2, kind: input, shape index: {}]   ;;  %s1380_s3 = inlined_call_operand.vmem [shape: f32[16,1], index: 3, kind: input, shape index: {}]   ;;  %s1381_s4 = inlined_call_operand.vmem [shape: bf16[8,16], index: 4, kind: input, shape index: {}]   ;;  %s1382_s5 = inlined_call_operand.vmem [shape: bf16[256,1], index: 5, kind: input, shape index: {}]   ;;  %s1383_s6 = inlined_call_operand.vmem [shape: bf16[2,16,256], index: 6, kind: input, shape index: {}]   ;;  %s1384_s7 = inlined_call_operand.hbm [shape: f32[2,8,256], index: 7, kind: output, shape index: {0}]   ;;  %s1385_s8 = inlined_call_operand.vmem [shape: f32[2,1,16,1], index: 8, kind: output, shape index: {1}]  }
   0x1   :  { %17 = vsyncpa [#allocation5 + $0x1], 0  ;;  %s1186_s26 = smov 0   ;;  %s1188_s27 = smov 0  }
   0x2   :  { %s1190_s28 = smov 0   ;;  %s1192_s29 = smov 0  }
   0x3   :  { %s1194_s30 = smov 0   ;;  %s1196_s9 = smov 0  }
   0x4 LB: > { %s908_s10 = sadd.s32 4294967295, %s1136_s9   ;;  %s909_s11 = sadd.s32 4294967294, %s1136_s9   ;;  %s1136_s9 = sphi %s1196_s9, %s23_s9   ;;  %s1132_s30 = sphi %s1194_s30, %s1392_s30   ;;  %s1128_s29 = sphi %s1192_s29, %s1391_s29   ;;  %s1124_s28 = sphi %s1190_s28, %s1390_s28   ;;  %s1120_s27 = sphi %s1188_s27, %s1389_s27   ;;  %s1116_s26 = sphi %s1186_s26, %s1388_s26  }
   0x5   : > { %s35_s12 = sadd.s32 1, %s1132_s30  ;;  %s189_s13 = sadd.s32 1, %s1124_s28 }
   0x6   : > { %p37_p0 = scmp.ge.s32.totalorder %s35_s12, 2  ;;  %p199_p1 = scmp.ne.s32.totalorder %s1124_s28, %s1120_s27 }
   0x7   : > { %p200_p2 = scmp.eq.s32.totalorder %s908_s10, 1  ;;  %p205_p3 = scmp.ne.s32.totalorder %s1120_s27, %s1116_s26 }
   0x8   : > { %s1394_s12 = smov (%p37_p0, %s35_s12), 0  ;;  %p206_p5 = scmp.eq.s32.totalorder %s909_s11, 1 }
   0x9   : > { %p1226_p4 = por %p200_p2, %p199_p1  ;;  %s184_s15 = ssub.s32 %s1132_s30, %s1394_s12 }
   0xa   : > { %p913_p6 = scmp.ge.s32.totalorder %s1136_s9, 1  ;;  %p187_p7 = scmp.eq.s32.totalorder %s184_s15, 0 }
   0xb   : > { %p1233_p8 = por %p206_p5, %p205_p3  ;;  %p296_p9 = scmp.lt.s32.totalorder %s1136_s9, 3 }
   0xc   : > { %s1239_s17 = scalar_select %p187_p7, %s1124_s28, %s189_s13  }
   0xd   : > { %p297_p10 = pnand %p913_p6, %p296_p9 }
   0xe   : > { %p356_p11 = scmp.lt.s32.totalorder (!%p297_p10), %s1128_s29, 1  ;;  %s341_s18 = sand.u32 (!%p297_p10), 1, %s1120_s27  }
   0xf   : > { %300 = sbr.rel (%p297_p10) target bundleno = 465 (0x1d1), region = 44  ;;  %s914_s19 = sshll.u32 (!%p297_p10), %s341_s18, 4 }
  0x10   : > { %s343_s20 = scalar_lea.vmem (!%p297_p10), [#allocation4], %s914_s19  ;;  %s961_s23 = sshll.u32 (!%p297_p10), %s1128_s29, 8 }
  0x11   : > { %s755_s21 = sshll.u32 (!%p297_p10), %s343_s20, 4  ;;  %s1324_s21 = int_to_ptr.vmem [resolvable:$true] %s755_s21 }
  0x12   : > { %s1060_s13 = scalar_lea.vmem (!%p297_p10), %s1324_s21, 256 }
  0x13   : > { %p1061_p12 = scmp.ne.s32.totalorder (!%p297_p10), %s1324_s21, %s1060_s13 }
  0x14   : > { %v1138_v0 = vmov 0   ;;  %v400_v1 = vld [vmem:[%s1380_s3] sm:$0xff]  ;;  %v401_v2 = vld [vmem:[%s1380_s3 + $0x8] sm:$0xff]  ;;  %s1249_s22 = scalar_select %p356_p11, %s1128_s29, 1  ;;  %v1044_v3 = vld [vmem:[%s1382_s5 + $0x78] sm:$0xff]   ;;  %vm421_vm0 = vcmask 1041408  }
  0x15   : > { %460 = vmatprep.mubr.bf16.mxu1 %v1138_v0  ;;  %1041 = vset.pattern.permute.xlu0 %v1138_v0  ;;  %v1045_v4 = vld [vmem:[%s1382_s5 + $0x38] sm:$0xff]   ;;  %v1043_v10 = vld [vmem:[%s1379_s2] sm:$0xff]   ;;  %vm417_vm1 = vcmask 31744   ;;  %v1046_v11 = vld [vmem:[%s1382_s5 + $0x70] sm:$0xff]   ;;  %v1139_v59 = vmov 1.0|1.0   ;;  %p1062_p13 = pnand %p1061_p12, %p1226_p4 }
  0x16   : > { %404 = vperm.xlu0 %1041, %v400_v1   ;;  %s958_s10 = sshll.u32 %s1249_s22, 3  ;;  %962 = vmatprep.subr.bf16.mxu0 %v1044_v3  ;;  %v1047_v12 = vld [vmem:[%s1382_s5 + $0x30] sm:$0xff]   ;;  %v1048_v13 = vld [vmem:[%s1382_s5 + $0x68] sm:$0xff]   ;;  %v1050_v15 = vld [vmem:[%s1382_s5 + $0x60] sm:$0xff]   ;;  %s959_s24 = sshll.u32 %s1249_s22, 4  ;;  %vm510_vm8 = vcmask 130048  }
  0x17   : > { %s363_s15 = scalar_lea.vmem %s1378_s1, %s958_s10  ;;  %963 = vmatpush3.bf16.msra.mxu0 %v1045_v4  ;;  %v1049_v14 = vld [vmem:[%s1382_s5 + $0x28] sm:$0xff]   ;;  %v1051_v16 = vld [vmem:[%s1382_s5 + $0x20] sm:$0xff]   ;;  %v1052_v17 = vld [vmem:[%s1382_s5 + $0x58] sm:$0xff]   ;;  %s379_s11 = scalar_lea.vmem %s1383_s6, %s959_s24  ;;  %vm726_vm9 = vcmask 7168  }
  0x18   : > { %v392_v5 = vld [vmem:[%s363_s15] sm:$0xff]  ;;  %964 = vmatprep.subr.bf16.mxu0 %v1046_v11  ;;  %v1053_v18 = vld [vmem:[%s1382_s5 + $0x18] sm:$0xff]   ;;  %v1054_v19 = vld [vmem:[%s1382_s5 + $0x50] sm:$0xff]   ;;  %s1322_s10 = scalar_lea.vmem %s1385_s8, %s959_s24  ;;  %s1329_s22 = scalar_lea.hbm %s1384_s7, %s961_s23 }
  0x19   : > { %v394_v6 = vcombine.high %v392_v5, %v392_v5  ;;  %v396_v7 = vpack.c.bf16 %v392_v5, %v392_v5  ;;  %v1055_v20 = vld [vmem:[%s1382_s5 + $0x10] sm:$0xff]   ;;  %v1056_v21 = vld [vmem:[%s1382_s5 + $0x48] sm:$0xff]   ;;  %v1058_v23 = vld [vmem:[%s1382_s5 + $0x40] sm:$0xff]   ;;  %s730_s24 = scalar_lea.sflag [#allocation5], %s341_s18  ;;  %p1063_p0 = pneg %p1062_p13 }
  0x1a   : > { %409 = vperm.xlu0 %1041, %v401_v2   ;;  %v1057_v22 = vld [vmem:[%s1382_s5 + $0x8] sm:$0xff]   ;;  %v1059_v24 = vld [vmem:[%s1382_s5] sm:$0xff]   ;;  %s1140_s15 = smov [#allocation4]  }
  0x1b   : > { %v397_v8 = vpack.c.bf16 %v394_v6, %v394_v6  ;;  %v423_v9 = vsel %vm421_vm0, %v396_v7, 0  ;;  %965 = vmatpush3.bf16.msra.mxu0 %v1047_v12  ;;  %v471_v27 = vld [vmem:[%s379_s11] sm:$0xff]  ;;  %v472_v28 = vld [vmem:[%s379_s11 + $0x8] sm:$0xff]  ;;  %s1064_s19 = sshll.u32 %s1140_s15, 4  ;;  %s1065_s19 = int_to_ptr.vmem [resolvable:$false] %s1064_s19 }
  0x1c   : > { %966 = vmatprep.subr.bf16.mxu0 %v1048_v13  ;;  %v473_v31 = vunpack.c.l.bf16 %v471_v27  ;;  %v475_v32 = vunpack.c.l.bf16 %v472_v28  ;;  %v474_v36 = vunpack.c.h.bf16 %v471_v27  ;;  %v476_v38 = vunpack.c.h.bf16 %v472_v28  ;;  %v509_v60 = vld [vmem:[%s1381_s4] sm:$0xf]  ;;  %s1066_s0 = scalar_lea.vmem %s1065_s19, 512  ;;  %p1067_p1 = scmp.lt.s32.totalorder %s1324_s21, %s1065_s19 }
  0x1d   : > { %922 = vmatprep.subr.msk.bf16.mxu1 %vm421_vm0, %v397_v8  ;;  %p1068_p2 = scmp.lt.s32.totalorder %s1066_s0, %s1060_s13 }
  0x1e   : > { %443 = vmatpush1.bf16.msra.mxu1 %v423_v9 }
  0x1f   : > { %967 = vmatpush3.bf16.msra.mxu0 %v1049_v14  ;;  %p1069_p3 = por %p1068_p2, %p1067_p1 }
  0x20   : > { %968 = vmatprep.subr.bf16.mxu0 %v1050_v15 }
  0x21   : > { %923 = vmatmul.mubr.msk.bf16.vlgmr.msra.gmra.mxu1 %vm417_vm1, %v1043_v10  ;;  %p1070_p5 = pnand %p1069_p3, %p1063_p0 }
  0x22   : > { %546 = vmatprep.mubr.bf16.mxu1 %v1138_v0 }
  0x23   : > { %969 = vmatpush3.bf16.msra.mxu0 %v1051_v16 }
  0x24   : > { %970 = vmatprep.subr.bf16.mxu0 %v1052_v17 }
  0x27   : > { %971 = vmatpush3.bf16.msra.mxu0 %v1053_v18 }
  0x28   : > { %972 = vmatprep.subr.bf16.mxu0 %v1054_v19 }
  0x2b   : > { %973 = vmatpush3.bf16.msra.mxu0 %v1055_v20 }
  0x2c   : > { %974 = vmatprep.subr.bf16.mxu0 %v1056_v21 }
  0x2f   : > { %975 = vmatpush3.bf16.msra.mxu0 %v1057_v22 }
  0x30   : > { %976 = vmatprep.subr.bf16.mxu0 %v1058_v23 }
  0x33   : > { %977 = vmatpush3.bf16.msra.mxu0 %v1059_v24 }
  0x91   : > { %v405_v25 = vpop.permute.xlu0 %404 }
  0x95   : > { %v410_v33 = vpop.permute.xlu0 %409 }
  0xe1   : > { %v462_v26 = vpop.f32.mrf.mxu1 }
  0xe2   : > { %v463_v30 = vadd.f32 %v462_v26, %v405_v25 }
  0xe3   : > { %v464_v29 = vpop.f32.mrf.mxu1 }
  0xe4   : > { %v465_v35 = vadd.f32 %v464_v29, %v405_v25  ;;  %v477_v40 = vadd.f32 %v473_v31, %v463_v30 }
  0xe5   : > { %v466_v34 = vpop.f32.mrf.mxu1 }
  0xe6   : > { %v467_v37 = vadd.f32 %v466_v34, %v410_v33  ;;  %v478_v43 = vadd.f32 %v474_v36, %v465_v35 }
  0xe7   : > { %v468_v39 = vpop.f32.mrf.mxu1 }
  0xe8   : > { %v479_v41 = vadd.f32 %v475_v32, %v467_v37  ;;  %v469_v42 = vadd.f32 %v468_v39, %v410_v33 }
  0xea   : > { %v481_v44 = vmax.f32 %v477_v40, %v479_v41  ;;  %v480_v45 = vadd.f32 %v476_v38, %v469_v42 }
  0xec   : > { %v482_v46 = vrot.slane %v481_v44, 4  ;;  %v488_v47 = vmax.f32 %v478_v43, %v480_v45 }
  0xee   : > { %v483_v48 = vmax.f32 %v481_v44, %v482_v46  ;;  %v489_v49 = vrot.slane %v488_v47, 4 }
  0xf0   : > { %v484_v50 = vrot.slane %v483_v48, 2  ;;  %v490_v51 = vmax.f32 %v488_v47, %v489_v49 }
  0xf2   : > { %v485_v52 = vmax.f32 %v483_v48, %v484_v50  ;;  %v491_v53 = vrot.slane %v490_v51, 2 }
  0xf4   : > { %v486_v54 = vrot.slane %v485_v52, 1  ;;  %v492_v55 = vmax.f32 %v490_v51, %v491_v53 }
  0xf6   : > { %v487_v56 = vmax.f32 %v485_v52, %v486_v54  ;;  %v493_v57 = vrot.slane %v492_v55, 1 }
  0xf8   : > { %v494_v58 = vmax.f32 %v492_v55, %v493_v57  ;;  %vm495_vm2 = vcmp.eq.f32.partialorder %v477_v40, %v487_v56  ;;  %vm497_vm3 = vcmp.eq.f32.partialorder %v479_v41, %v487_v56 }
  0xf9   : > { %vm930_vm7 = vmpackc.low %vm497_vm3, %vm495_vm2 }
  0xfa   : > { %vm496_vm4 = vcmp.eq.f32.partialorder %v478_v43, %v494_v58  ;;  %vm498_vm5 = vcmp.eq.f32.partialorder %v480_v45, %v494_v58 }
  0xfb   : > { %vm928_vm6 = vmpackc.low %vm498_vm5, %vm496_vm4 }
  0xfc   : > { %929 = vmatprep.subr.msk.bf16.mxu1 %vm928_vm6, %v1139_v59  ;;  %950 = vmatprep.mubr.msk.bf16.mxu0 %vm928_vm6, %v1139_v59 }
  0xfd   : > { %931 = vmatpush1.bf16.msk.msra.mxu1 %vm930_vm7, %v1139_v59  ;;  %952 = vmatmul.mubr.msk.bf16.vlgmr.msra.gmra.mxu0 %vm930_vm7, %v1139_v59 }
 0x100   : > { %932 = vmatmul.mubr.msk.bf16.vlgmr.msra.gmra.mxu1 %vm510_vm8, %v509_v60 }
 0x1bd   : > { %v978_v61 = vpop.f32.mrf.mxu0 }
 0x1bf   : > { %v979_v62 = vpop.f32.mrf.mxu0 }
 0x1c0   : > { %v980_v63 = vadd.f32 %v979_v62, %v978_v61  ;;  %v548_v0 = vpop.f32.mrf.mxu1 }
 0x1c1   : > { %555 = vst [vmem:[%s343_s20] sm:$0xff] %v548_v0  ;;  %v981_v1 = vpop.f32.mrf.mxu0 }
 0x1c2   : > { %727 = vst.msk [vmem:[%s1322_s10] sm:$0xff] %vm726_vm9, %v980_v63  ;;  %v550_v2 = vpop.f32.mrf.mxu1 }
 0x1c3   : > { %556 = vst [vmem:[%s343_s20 + $0x8] sm:$0xff] %v550_v2  ;;  %v982_v3 = vpop.f32.mrf.mxu0 }
 0x1c4   : > { %v983_v4 = vadd.f32 %v982_v3, %v981_v1  ;;  %v552_v5 = vpop.f32.mrf.mxu1 }
 0x1c5   : > { %1073 = shalt.err (!%p1070_p5)
}
 0x1c6   : > { %s1074_s20 = scalar_lea.hbm %s1329_s22, 256  ;;  %s1078_s25 = scalar_lea.hbm %s1384_s7, 512 }
 0x1c7   : > { %p1075_p6 = scmp.ne.s32.totalorder %s1329_s22, %s1074_s20  ;;  %p1079_p10 = scmp.lt.s32.totalorder %s1329_s22, %s1384_s7 }
 0x1c8   : > { %p1080_p11 = scmp.lt.s32.totalorder %s1078_s25, %s1074_s20 }
 0x1c9   : > { %p1076_p7 = pnand %p1075_p6, %p1226_p4 }
 0x1ca   : > { %p1081_p12 = por %p1080_p11, %p1079_p10 }
 0x1cb   : > { %p1077_p9 = pneg %p1076_p7 }
 0x1cd   : > { %p1082_p13 = pnand %p1081_p12, %p1077_p9 }
 0x1cf   : > { %1085 = shalt.err (!%p1082_p13)
}
 0x1d0   : > { %984 = dma.vmem_to_hbm [thread:$0]  (%p1226_p4), %s1324_s21, 256, %s1329_s22, %s730_s24   ;;  %728 = vst.msk [vmem:[%s1322_s10 + $0x8] sm:$0xff] %vm726_vm9, %v983_v4  ;;  %v553_v6 = vpop.f32.mrf.mxu1 }
 0x1d1 PF: > { %p990_p0 = scmp.ge.s32.totalorder %s1136_s9, 2  ;;  %s770_s13 = sand.u32 1, %s1116_s26  }
 0x1d2   : > { %s771_s15 = scalar_lea.sflag [#allocation5], %s770_s13 }
 0x1d3   : > { %p987_p1 = pnand %p990_p0, %p1233_p8 }
 0x1d5   : > { %p988_p2 = pneg %p987_p1 }
 0x1d7   : > { %1111 = dma.done.wait (%p988_p2), %s771_s15, 256  }
 0x1d8   : > { %1113 = vsyncadd (%p988_p2), %s771_s15, 4294967040  ;;  %s23_s9 = sadd.s32 1, %s1136_s9   ;;  %s1388_s26 = smov %s1120_s27 }
 0x1d9   : > { %p20_p3 = scmp.ge.s32.totalorder %s23_s9, 4   ;;  %s1389_s27 = smov %s1124_s28 }
 0x1da   : > { %s1390_s28 = smov %s1239_s17  ;;  %s1391_s29 = smov %s1132_s30 }
 0x1db   : > { %s1392_s30 = smov %s1394_s12  ;;  %22 = sbr.rel (!%p20_p3) target bundleno = 4 (0x4), region = 97 }
 0x1e0   :  { %788 = vsyncpa [#allocation5], 1 }
 0x1e1   :  { %790 = vsyncpa [#allocation5 + $0x1], 1 }

</bundles_post_ra>
